<compile_context>
chip_gen: v5e
topology: v5e:2x2
jax: 0.10.0
libtpu: 0.0.40
codegen_flags: <defaults>
</compile_context>

<pallas_src>
import functools

import jax
import jax.numpy as jnp
from jax.experimental import pallas as pl
from jax.experimental.pallas import tpu as pltpu


# ---------------------------------------------------------------------------
# Fused MLP kernel: x -> [Linear + ReLU] * (L-1) -> Linear
# Ref order: x_ref, (w1, b1, w2, b2, ..., wL, bL), o_ref
# ---------------------------------------------------------------------------
def _mlp_fused_kernel(x_ref, *refs, num_layers: int):
    o_ref = refs[-1]
    wb_refs = refs[:-1]

    h = x_ref[...]  # f32 activation tile (TB, Din) straight from HBM
    for li in range(num_layers):
        w_ref = wb_refs[2 * li]
        b_ref = wb_refs[2 * li + 1]
        # MXU matmul: bf16 x bf16 operands, f32 accumulation.  The f32->bf16
        # cast of the activation is a VPU op hidden under the MXU/DMA.
        y = jnp.dot(h.astype(w_ref.dtype), w_ref[...],
                    preferred_element_type=jnp.float32)
        y = y + b_ref[...]  # (1, Dout_pad) f32 bias broadcasts over rows
        if li < num_layers - 1:
            y = jnp.maximum(y, 0.0)
        h = y  # stays resident in VMEM/vregs; never spills to HBM
    o_ref[...] = h.astype(o_ref.dtype)  # bf16, lane-dense writeback


def _round_up(n: int, m: int) -> int:
    return ((n + m - 1) // m) * m


def _pad2d(a, rows: int, cols: int):
    pr, pc = rows - a.shape[0], cols - a.shape[1]
    if pr == 0 and pc == 0:
        return a
    return jnp.pad(a, ((0, pr), (0, pc)))


# ---------------------------------------------------------------------------
# One-time parameter preprocessing (hoisted out of the per-call forward path).
# Weights stored as [din, dout] (transposed vs. nn.Linear) so the kernel
# computes x @ W + b directly.  Only layer OUTPUT dims are padded to 128; the
# first layer's input dim is left unpadded (full-dim block, cheaper HBM read).
# ---------------------------------------------------------------------------
def prepare_params(params):
    dims = [params[0][0].shape[0]] + [w.shape[1] for (w, _) in params]
    pdims = [dims[0]] + [_round_up(d, 128) for d in dims[1:]]
    prepped = []
    for li, (w, b) in enumerate(params):
        wp = _pad2d(w, pdims[li], pdims[li + 1]).astype(jnp.bfloat16)
        bp = _pad2d(b, 1, pdims[li + 1]).astype(jnp.float32)
        prepped.append((wp, bp))
    return prepped, dims, pdims


def mlp_forward(x, prepped, dims, pdims, *, out_dtype=jnp.bfloat16):
    """Fused MLP forward.

    x: [B, input_dim] f32 (unpadded, uncast).
    prepped/dims/pdims: from prepare_params().
    Returns [B, output_dim] f32 (bf16-precision-limited due to bf16 writeback).
    """
    B, Din = x.shape
    assert Din == dims[0]
    num_layers = len(prepped)

    # Batch tiling: big tiles (<=512 rows) amortize per-step pipeline overhead
    # (~600 cyc) and per-layer MXU weight pushes; multiple of 16 for bf16
    # sublane packing; >=2 blocks for moderate batches (v7x has 2 TensorCores).
    Bp0 = _round_up(B, 16)
    if Bp0 <= 16:
        TB = Bp0
    elif Bp0 <= 1024:
        TB = min(512, _round_up(Bp0 // 2, 16))
    else:
        TB = 512
    Bp = _round_up(Bp0, TB)

    xp = _pad2d(x, Bp, Din)  # batch-only pad; no feature pad, no dtype convert

    inputs = [xp]
    for wp, bp in prepped:
        inputs += [wp, bp]

    # ---- Cost estimate / VMEM plan based on the ACTUAL padded traffic ----
    weight_bytes = sum(int(wp.size) * wp.dtype.itemsize +
                       int(bp.size) * bp.dtype.itemsize for wp, bp in prepped)
    out_elem = jnp.dtype(out_dtype).itemsize
    flops = sum(2 * Bp * pdims[li] * pdims[li + 1] for li in range(num_layers))
    bytes_accessed = (Bp * Din * x.dtype.itemsize       # f32 unpadded input read
                      + weight_bytes                     # bf16 W + f32 b (once)
                      + Bp * pdims[-1] * out_elem)       # bf16 padded output write

    def build(single_buffer_weights: bool):
        wbufs = 1 if single_buffer_weights else 2
        vmem_est = (2 * TB * Din * x.dtype.itemsize      # double-buffered x blocks
                    + 2 * TB * pdims[-1] * out_elem      # double-buffered out blocks
                    + wbufs * weight_bytes               # resident weights/biases
                    + 2 * TB * max(pdims) * 4)           # live f32 intermediates
        vmem_limit = int(max(32 << 20, min(vmem_est + (8 << 20), 64 << 20)))
        # TODO(synk): when resident padded weights approach ~48 MiB (large hidden
        # dims on v7x's 64 MiB VMEM), split the feature dim onto a grid axis with
        # an f32 accumulator instead of keeping every layer's full W resident.

        w_kwargs = ({"pipeline_mode": pl.Buffered(1)}
                    if single_buffer_weights else {})
        in_specs = [pl.BlockSpec((TB, Din), lambda i: (i, 0))]
        for li in range(num_layers):
            in_specs.append(pl.BlockSpec((pdims[li], pdims[li + 1]),
                                         lambda i: (0, 0), **w_kwargs))
            in_specs.append(pl.BlockSpec((1, pdims[li + 1]),
                                         lambda i: (0, 0), **w_kwargs))
        out_spec = pl.BlockSpec((TB, pdims[-1]), lambda i: (i, 0))

        return pl.pallas_call(
            functools.partial(_mlp_fused_kernel, num_layers=num_layers),
            out_shape=jax.ShapeDtypeStruct((Bp, pdims[-1]), out_dtype),
            grid=(Bp // TB,),
            in_specs=in_specs,
            out_specs=out_spec,
            compiler_params=pltpu.CompilerParams(
                dimension_semantics=("parallel",),     # batch blocks across TCs
                vmem_limit_bytes=vmem_limit),
            cost_estimate=pl.CostEstimate(
                flops=flops, transcendentals=0, bytes_accessed=bytes_accessed),
        )

    try:
        out_padded = build(single_buffer_weights=True)(*inputs)
    except Exception:
        # Fallback if this JAX build rejects Buffered(1) single-buffering.
        out_padded = build(single_buffer_weights=False)(*inputs)

    return out_padded[:B, :dims[-1]].astype(jnp.float32)


# ---------------------------------------------------------------------------
# Parameter init (matches nn.Linear default uniform init; weights stored
# transposed as [in, out]).
# ---------------------------------------------------------------------------
def init_mlp_params(key, input_dim, hidden_dim, output_dim, num_layers=3):
    dims = [input_dim] + [hidden_dim] * (num_layers - 1) + [output_dim]
    params = []
    for li in range(num_layers):
        din, dout = dims[li], dims[li + 1]
        key, kw, kb = jax.random.split(key, 3)
        bound = float(1.0 / (din ** 0.5))
        w = jax.random.uniform(kw, (din, dout), jnp.float32, -bound, bound)
        b = jax.random.uniform(kb, (1, dout), jnp.float32, -bound, bound)
        params.append((w, b))
    return params


def _reference_forward(x, params, *, mimic_kernel=True):
    """Plain-JAX reference. With mimic_kernel=True it mirrors the kernel's
    bf16-operand / f32-accumulate / bf16-writeback numerics."""
    def rb(a):
        return a.astype(jnp.bfloat16).astype(jnp.float32) if mimic_kernel else a

    h = x
    n = len(params)
    for i, (w, b) in enumerate(params):
        h = jnp.dot(rb(h), rb(w), preferred_element_type=jnp.float32) + b
        if i < n - 1:
            h = jnp.maximum(h, 0.0)
    if mimic_kernel:
        h = rb(h)  # final bf16 writeback
    return h


if __name__ == "__main__":
    key = jax.random.PRNGKey(0)
    batch, input_dim, hidden_dim, output_dim, num_layers = 8, 32, 128, 16, 3

    kx, kp = jax.random.split(key)
    x = jax.random.normal(kx, (batch, input_dim), jnp.float32)
    params = init_mlp_params(kp, input_dim, hidden_dim, output_dim, num_layers)

    # Hoisted preprocessing: pad + cast weights/biases ONCE, not per forward.
    prepped, dims, pdims = prepare_params(params)

    out = jax.block_until_ready(mlp_forward(x, prepped, dims, pdims))

    # Tight check against a reference with identical numerics, plus a looser
    # check against the pure-f32 reference (bf16 operands + bf16 output).
    ref_bf16 = _reference_forward(x, params, mimic_kernel=True)
    ref_f32 = _reference_forward(x, params, mimic_kernel=False)

    assert out.shape == (batch, output_dim)
    assert jnp.allclose(out, ref_bf16, atol=2e-2, rtol=2e-2)
    assert jnp.allclose(out, ref_f32, atol=6e-2, rtol=6e-2)

    print("KERNEL_OK")
</pallas_src>

<mosaic_0001>
module attributes {stable_mosaic.version = 11 : i64} {
  func.func @_mlp_fused_kernel(%arg0: i32, %arg1: memref<16x32xf32, #tpu.memory_space<vmem>>, %arg2: memref<32x128xbf16, #tpu.memory_space<vmem>>, %arg3: memref<1x128xf32, #tpu.memory_space<vmem>>, %arg4: memref<128x128xbf16, #tpu.memory_space<vmem>>, %arg5: memref<1x128xf32, #tpu.memory_space<vmem>>, %arg6: memref<128x128xbf16, #tpu.memory_space<vmem>>, %arg7: memref<1x128xf32, #tpu.memory_space<vmem>>, %arg8: memref<16x128xbf16, #tpu.memory_space<vmem>>) attributes {dimension_semantics = [#tpu.dimension_semantics<parallel>], iteration_bounds = array<i64: 1>, scalar_prefetch = 0 : i64, scratch_operands = 0 : i64, tpu.core_type = #tpu.core_type<tc>, window_params = [{transform_indices = @transform_0, window_bounds = array<i64: 16, 32>}, {pipeline_mode = #tpu.pipeline_mode<synchronous>, transform_indices = @transform_1, window_bounds = array<i64: 32, 128>}, {pipeline_mode = #tpu.pipeline_mode<synchronous>, transform_indices = @transform_2, window_bounds = array<i64: 1, 128>}, {pipeline_mode = #tpu.pipeline_mode<synchronous>, transform_indices = @transform_3, window_bounds = array<i64: 128, 128>}, {pipeline_mode = #tpu.pipeline_mode<synchronous>, transform_indices = @transform_4, window_bounds = array<i64: 1, 128>}, {pipeline_mode = #tpu.pipeline_mode<synchronous>, transform_indices = @transform_5, window_bounds = array<i64: 128, 128>}, {pipeline_mode = #tpu.pipeline_mode<synchronous>, transform_indices = @transform_6, window_bounds = array<i64: 1, 128>}, {transform_indices = @transform_7, window_bounds = array<i64: 16, 128>}]} {
    %c0 = arith.constant 0 : index
    %c0_0 = arith.constant 0 : index
    %0 = vector.load %arg1[%c0, %c0_0] : memref<16x32xf32, #tpu.memory_space<vmem>>, vector<16x32xf32>
    %1 = arith.truncf %0 : vector<16x32xf32> to vector<16x32xbf16>
    %c0_1 = arith.constant 0 : index
    %c0_2 = arith.constant 0 : index
    %2 = vector.load %arg2[%c0_1, %c0_2] : memref<32x128xbf16, #tpu.memory_space<vmem>>, vector<32x128xbf16>
    %cst = arith.constant dense<0.000000e+00> : vector<16x128xf32>
    %3 = tpu.matmul %1, %2, %cst {dimension_numbers = #tpu.dot_dimension_numbers<[1], [0], [0], [1], [0, 0, 1, 1], [], []>} : vector<16x32xbf16>, vector<32x128xbf16>, vector<16x128xf32> -> vector<16x128xf32>
    %c0_3 = arith.constant 0 : index
    %c0_4 = arith.constant 0 : index
    %4 = vector.load %arg3[%c0_3, %c0_4] : memref<1x128xf32, #tpu.memory_space<vmem>>, vector<1x128xf32>
    %5 = vector.broadcast %4 : vector<1x128xf32> to vector<16x128xf32>
    %6 = arith.addf %3, %5 : vector<16x128xf32>
    %cst_5 = arith.constant 0.000000e+00 : f32
    %7 = vector.broadcast %cst_5 : f32 to vector<16x128xf32>
    %8 = arith.maximumf %6, %7 : vector<16x128xf32>
    %9 = arith.truncf %8 : vector<16x128xf32> to vector<16x128xbf16>
    %c0_6 = arith.constant 0 : index
    %c0_7 = arith.constant 0 : index
    %10 = vector.load %arg4[%c0_6, %c0_7] : memref<128x128xbf16, #tpu.memory_space<vmem>>, vector<128x128xbf16>
    %cst_8 = arith.constant dense<0.000000e+00> : vector<16x128xf32>
    %11 = tpu.matmul %9, %10, %cst_8 {dimension_numbers = #tpu.dot_dimension_numbers<[1], [0], [0], [1], [0, 0, 1, 1], [], []>} : vector<16x128xbf16>, vector<128x128xbf16>, vector<16x128xf32> -> vector<16x128xf32>
    %c0_9 = arith.constant 0 : index
    %c0_10 = arith.constant 0 : index
    %12 = vector.load %arg5[%c0_9, %c0_10] : memref<1x128xf32, #tpu.memory_space<vmem>>, vector<1x128xf32>
    %13 = vector.broadcast %12 : vector<1x128xf32> to vector<16x128xf32>
    %14 = arith.addf %11, %13 : vector<16x128xf32>
    %cst_11 = arith.constant 0.000000e+00 : f32
    %15 = vector.broadcast %cst_11 : f32 to vector<16x128xf32>
    %16 = arith.maximumf %14, %15 : vector<16x128xf32>
    %17 = arith.truncf %16 : vector<16x128xf32> to vector<16x128xbf16>
    %c0_12 = arith.constant 0 : index
    %c0_13 = arith.constant 0 : index
    %18 = vector.load %arg6[%c0_12, %c0_13] : memref<128x128xbf16, #tpu.memory_space<vmem>>, vector<128x128xbf16>
    %cst_14 = arith.constant dense<0.000000e+00> : vector<16x128xf32>
    %19 = tpu.matmul %17, %18, %cst_14 {dimension_numbers = #tpu.dot_dimension_numbers<[1], [0], [0], [1], [0, 0, 1, 1], [], []>} : vector<16x128xbf16>, vector<128x128xbf16>, vector<16x128xf32> -> vector<16x128xf32>
    %c0_15 = arith.constant 0 : index
    %c0_16 = arith.constant 0 : index
    %20 = vector.load %arg7[%c0_15, %c0_16] : memref<1x128xf32, #tpu.memory_space<vmem>>, vector<1x128xf32>
    %21 = vector.broadcast %20 : vector<1x128xf32> to vector<16x128xf32>
    %22 = arith.addf %19, %21 : vector<16x128xf32>
    %23 = arith.truncf %22 : vector<16x128xf32> to vector<16x128xbf16>
    %c0_17 = arith.constant 0 : index
    %c0_18 = arith.constant 0 : index
    %24 = vector.load %arg8[%c0_17, %c0_18] : memref<16x128xbf16, #tpu.memory_space<vmem>>, vector<16x128xbf16>
    tpu.vector_store %arg8[%c0_17, %c0_18], %23 {strides = array<i32>} : memref<16x128xbf16, #tpu.memory_space<vmem>>, vector<16x128xbf16>,
    return
  }
  func.func @transform_0(%arg0: i32) -> (i32, i32) {
    %c0_i32 = arith.constant 0 : i32
    %c0_i32_0 = arith.constant 0 : i32
    return %arg0, %c0_i32 : i32, i32
  }
  func.func @transform_1(%arg0: i32) -> (i32, i32) {
    %c0_i32 = arith.constant 0 : i32
    %c0_i32_0 = arith.constant 0 : i32
    %c0_i32_1 = arith.constant 0 : i32
    return %c0_i32, %c0_i32_0 : i32, i32
  }
  func.func @transform_2(%arg0: i32) -> (i32, i32) {
    %c0_i32 = arith.constant 0 : i32
    %c0_i32_0 = arith.constant 0 : i32
    %c0_i32_1 = arith.constant 0 : i32
    return %c0_i32, %c0_i32_0 : i32, i32
  }
  func.func @transform_3(%arg0: i32) -> (i32, i32) {
    %c0_i32 = arith.constant 0 : i32
    %c0_i32_0 = arith.constant 0 : i32
    %c0_i32_1 = arith.constant 0 : i32
    return %c0_i32, %c0_i32_0 : i32, i32
  }
  func.func @transform_4(%arg0: i32) -> (i32, i32) {
    %c0_i32 = arith.constant 0 : i32
    %c0_i32_0 = arith.constant 0 : i32
    %c0_i32_1 = arith.constant 0 : i32
    return %c0_i32, %c0_i32_0 : i32, i32
  }
  func.func @transform_5(%arg0: i32) -> (i32, i32) {
    %c0_i32 = arith.constant 0 : i32
    %c0_i32_0 = arith.constant 0 : i32
    %c0_i32_1 = arith.constant 0 : i32
    return %c0_i32, %c0_i32_0 : i32, i32
  }
  func.func @transform_6(%arg0: i32) -> (i32, i32) {
    %c0_i32 = arith.constant 0 : i32
    %c0_i32_0 = arith.constant 0 : i32
    %c0_i32_1 = arith.constant 0 : i32
    return %c0_i32, %c0_i32_0 : i32, i32
  }
  func.func @transform_7(%arg0: i32) -> (i32, i32) {
    %c0_i32 = arith.constant 0 : i32
    %c0_i32_0 = arith.constant 0 : i32
    return %arg0, %c0_i32 : i32, i32
  }
}

module attributes {stable_mosaic.version = 11 : i64} {
  func.func @_mlp_fused_kernel(%arg0: i32, %arg1: memref<16x32xf32, #tpu.memory_space<vmem>>, %arg2: memref<32x128xbf16, #tpu.memory_space<vmem>>, %arg3: memref<1x128xf32, #tpu.memory_space<vmem>>, %arg4: memref<128x128xbf16, #tpu.memory_space<vmem>>, %arg5: memref<1x128xf32, #tpu.memory_space<vmem>>, %arg6: memref<128x128xbf16, #tpu.memory_space<vmem>>, %arg7: memref<1x128xf32, #tpu.memory_space<vmem>>, %arg8: memref<16x128xbf16, #tpu.memory_space<vmem>>) attributes {dimension_semantics = [#tpu.dimension_semantics<parallel>], iteration_bounds = array<i64: 1>, scalar_prefetch = 0 : i64, scratch_operands = 0 : i64, tpu.core_type = #tpu.core_type<tc>, window_params = [{transform_indices = @transform_0, window_bounds = array<i64: 16, 32>}, {pipeline_mode = #tpu.pipeline_mode<synchronous>, transform_indices = @transform_1, window_bounds = array<i64: 32, 128>}, {pipeline_mode = #tpu.pipeline_mode<synchronous>, transform_indices = @transform_2, window_bounds = array<i64: 1, 128>}, {pipeline_mode = #tpu.pipeline_mode<synchronous>, transform_indices = @transform_3, window_bounds = array<i64: 128, 128>}, {pipeline_mode = #tpu.pipeline_mode<synchronous>, transform_indices = @transform_4, window_bounds = array<i64: 1, 128>}, {pipeline_mode = #tpu.pipeline_mode<synchronous>, transform_indices = @transform_5, window_bounds = array<i64: 128, 128>}, {pipeline_mode = #tpu.pipeline_mode<synchronous>, transform_indices = @transform_6, window_bounds = array<i64: 1, 128>}, {transform_indices = @transform_7, window_bounds = array<i64: 16, 128>}]} {
    %c0 = arith.constant 0 : index
    %c0_0 = arith.constant 0 : index
    %0 = vector.load %arg1[%c0, %c0_0] : memref<16x32xf32, #tpu.memory_space<vmem>>, vector<16x32xf32>
    %1 = arith.truncf %0 : vector<16x32xf32> to vector<16x32xbf16>
    %c0_1 = arith.constant 0 : index
    %c0_2 = arith.constant 0 : index
    %2 = vector.load %arg2[%c0_1, %c0_2] : memref<32x128xbf16, #tpu.memory_space<vmem>>, vector<32x128xbf16>
    %cst = arith.constant dense<0.000000e+00> : vector<16x128xf32>
    %3 = tpu.matmul %1, %2, %cst {dimension_numbers = #tpu.dot_dimension_numbers<[1], [0], [0], [1], [0, 0, 1, 1], [], []>} : vector<16x32xbf16>, vector<32x128xbf16>, vector<16x128xf32> -> vector<16x128xf32>
    %c0_3 = arith.constant 0 : index
    %c0_4 = arith.constant 0 : index
    %4 = vector.load %arg3[%c0_3, %c0_4] : memref<1x128xf32, #tpu.memory_space<vmem>>, vector<1x128xf32>
    %5 = vector.broadcast %4 : vector<1x128xf32> to vector<16x128xf32>
    %6 = arith.addf %3, %5 : vector<16x128xf32>
    %cst_5 = arith.constant 0.000000e+00 : f32
    %7 = vector.broadcast %cst_5 : f32 to vector<16x128xf32>
    %8 = arith.maximumf %6, %7 : vector<16x128xf32>
    %9 = arith.truncf %8 : vector<16x128xf32> to vector<16x128xbf16>
    %c0_6 = arith.constant 0 : index
    %c0_7 = arith.constant 0 : index
    %10 = vector.load %arg4[%c0_6, %c0_7] : memref<128x128xbf16, #tpu.memory_space<vmem>>, vector<128x128xbf16>
    %cst_8 = arith.constant dense<0.000000e+00> : vector<16x128xf32>
    %11 = tpu.matmul %9, %10, %cst_8 {dimension_numbers = #tpu.dot_dimension_numbers<[1], [0], [0], [1], [0, 0, 1, 1], [], []>} : vector<16x128xbf16>, vector<128x128xbf16>, vector<16x128xf32> -> vector<16x128xf32>
    %c0_9 = arith.constant 0 : index
    %c0_10 = arith.constant 0 : index
    %12 = vector.load %arg5[%c0_9, %c0_10] : memref<1x128xf32, #tpu.memory_space<vmem>>, vector<1x128xf32>
    %13 = vector.broadcast %12 : vector<1x128xf32> to vector<16x128xf32>
    %14 = arith.addf %11, %13 : vector<16x128xf32>
    %cst_11 = arith.constant 0.000000e+00 : f32
    %15 = vector.broadcast %cst_11 : f32 to vector<16x128xf32>
    %16 = arith.maximumf %14, %15 : vector<16x128xf32>
    %17 = arith.truncf %16 : vector<16x128xf32> to vector<16x128xbf16>
    %c0_12 = arith.constant 0 : index
    %c0_13 = arith.constant 0 : index
    %18 = vector.load %arg6[%c0_12, %c0_13] : memref<128x128xbf16, #tpu.memory_space<vmem>>, vector<128x128xbf16>
    %cst_14 = arith.constant dense<0.000000e+00> : vector<16x128xf32>
    %19 = tpu.matmul %17, %18, %cst_14 {dimension_numbers = #tpu.dot_dimension_numbers<[1], [0], [0], [1], [0, 0, 1, 1], [], []>} : vector<16x128xbf16>, vector<128x128xbf16>, vector<16x128xf32> -> vector<16x128xf32>
    %c0_15 = arith.constant 0 : index
    %c0_16 = arith.constant 0 : index
    %20 = vector.load %arg7[%c0_15, %c0_16] : memref<1x128xf32, #tpu.memory_space<vmem>>, vector<1x128xf32>
    %21 = vector.broadcast %20 : vector<1x128xf32> to vector<16x128xf32>
    %22 = arith.addf %19, %21 : vector<16x128xf32>
    %23 = arith.truncf %22 : vector<16x128xf32> to vector<16x128xbf16>
    %c0_17 = arith.constant 0 : index
    %c0_18 = arith.constant 0 : index
    %24 = vector.load %arg8[%c0_17, %c0_18] : memref<16x128xbf16, #tpu.memory_space<vmem>>, vector<16x128xbf16>
    tpu.vector_store %arg8[%c0_17, %c0_18], %23 {strides = array<i32>} : memref<16x128xbf16, #tpu.memory_space<vmem>>, vector<16x128xbf16>,
    return
  }
  func.func @transform_0(%arg0: i32) -> (i32, i32) {
    %c0_i32 = arith.constant 0 : i32
    %c0_i32_0 = arith.constant 0 : i32
    return %arg0, %c0_i32 : i32, i32
  }
  func.func @transform_1(%arg0: i32) -> (i32, i32) {
    %c0_i32 = arith.constant 0 : i32
    %c0_i32_0 = arith.constant 0 : i32
    %c0_i32_1 = arith.constant 0 : i32
    return %c0_i32, %c0_i32_0 : i32, i32
  }
  func.func @transform_2(%arg0: i32) -> (i32, i32) {
    %c0_i32 = arith.constant 0 : i32
    %c0_i32_0 = arith.constant 0 : i32
    %c0_i32_1 = arith.constant 0 : i32
    return %c0_i32, %c0_i32_0 : i32, i32
  }
  func.func @transform_3(%arg0: i32) -> (i32, i32) {
    %c0_i32 = arith.constant 0 : i32
    %c0_i32_0 = arith.constant 0 : i32
    %c0_i32_1 = arith.constant 0 : i32
    return %c0_i32, %c0_i32_0 : i32, i32
  }
  func.func @transform_4(%arg0: i32) -> (i32, i32) {
    %c0_i32 = arith.constant 0 : i32
    %c0_i32_0 = arith.constant 0 : i32
    %c0_i32_1 = arith.constant 0 : i32
    return %c0_i32, %c0_i32_0 : i32, i32
  }
  func.func @transform_5(%arg0: i32) -> (i32, i32) {
    %c0_i32 = arith.constant 0 : i32
    %c0_i32_0 = arith.constant 0 : i32
    %c0_i32_1 = arith.constant 0 : i32
    return %c0_i32, %c0_i32_0 : i32, i32
  }
  func.func @transform_6(%arg0: i32) -> (i32, i32) {
    %c0_i32 = arith.constant 0 : i32
    %c0_i32_0 = arith.constant 0 : i32
    %c0_i32_1 = arith.constant 0 : i32
    return %c0_i32, %c0_i32_0 : i32, i32
  }
  func.func @transform_7(%arg0: i32) -> (i32, i32) {
    %c0_i32 = arith.constant 0 : i32
    %c0_i32_0 = arith.constant 0 : i32
    return %arg0, %c0_i32 : i32, i32
  }
}

</mosaic_0001>

<bundles_post_ra>
// kernel: tpu_custom_call.1
= control target key start
LH: loop header
LB: loop body
LE: loop exit
PB: predicated region body
PF: predicated region fallthrough
CT: control target
= control target key end

     0   :  { %12 = vsyncpa [#allocation3], 0  ;;  %s648_s0 = inlined_call_operand.hbm [shape: f32[16,32], index: 0, kind: input, shape index: {}]   ;;  %s649_s1 = inlined_call_operand.hbm [shape: bf16[32,128], index: 1, kind: input, shape index: {}]   ;;  %s650_s2 = inlined_call_operand.vmem [shape: f32[1,128], index: 2, kind: input, shape index: {}]   ;;  %s651_s3 = inlined_call_operand.hbm [shape: bf16[128,128], index: 3, kind: input, shape index: {}]   ;;  %s652_s4 = inlined_call_operand.vmem [shape: f32[1,128], index: 4, kind: input, shape index: {}]   ;;  %s653_s5 = inlined_call_operand.hbm [shape: bf16[128,128], index: 5, kind: input, shape index: {}]   ;;  %s654_s6 = inlined_call_operand.vmem [shape: f32[1,128], index: 6, kind: input, shape index: {}]   ;;  %s655_s7 = inlined_call_operand.hbm [shape: bf16[16,128], index: 7, kind: output, shape index: {}]  }
   0x1   :  { %13 = vsyncpa [#allocation6], 0 }
   0x2   :  { %14 = vsyncpa [#allocation9], 0  ;;  %s33_s26 = sshll.u32 %s649_s1, 4  ;;  %s34_s26 = int_to_ptr.hbm [resolvable:$true] %s33_s26 }
   0x3   :  { %15 = vsyncpa [#allocation4], 0  ;;  %s563_s27 = smov [#allocation5]   ;;  %s20_s8 = sshll.u32 %s648_s0, 4  ;;  %s21_s8 = int_to_ptr.hbm [resolvable:$true] %s20_s8 }
   0x4   :  { %s35_s28 = sshll.u32 %s563_s27, 4  ;;  %s564_s9 = smov 64   ;;  %s36_s28 = int_to_ptr.vmem [resolvable:$true] %s35_s28 }
   0x5   :  { %s565_s10 = smov 4   ;;  %s566_s11 = smov [#allocation2]  }
   0x6   :  { %41 = dma.hbm_to_vmem [thread:$0]  %s34_s26, 256, %s36_s28, [#allocation6], %s564_s9, %s564_s9, %s565_s10  }
   0x7   :  { %s22_s12 = sshll.u32 %s566_s11, 4  ;;  %s567_s1 = smov 128   ;;  %s23_s12 = int_to_ptr.vmem [resolvable:$true] %s22_s12 }
   0x8   :  { %s568_s13 = smov 8   ;;  %s48_s16 = sshll.u32 %s651_s3, 4  ;;  %s49_s16 = int_to_ptr.hbm [resolvable:$true] %s48_s16 }
   0x9   :  { %28 = dma.hbm_to_vmem [thread:$0]  %s21_s8, 256, %s23_s12, [#allocation3], %s567_s1, %s567_s1, %s568_s13  }
   0xa   :  { %s569_s17 = smov [#allocation7]   ;;  %s63_s20 = sshll.u32 %s653_s5, 4  ;;  %s64_s20 = int_to_ptr.hbm [resolvable:$true] %s63_s20 }
   0xb   :  { %s50_s0 = sshll.u32 %s569_s17, 4  ;;  %s570_s21 = smov [#allocation8]   ;;  %s51_s0 = int_to_ptr.vmem [resolvable:$true] %s50_s0 }
   0xc   :  { %56 = dma.hbm_to_vmem [thread:$0]  %s49_s16, 1024, %s51_s0, [#allocation6], %s564_s9, %s564_s9, %s565_s10  }
   0xd   :  { %s65_s22 = sshll.u32 %s570_s21, 4  ;;  %s66_s22 = int_to_ptr.vmem [resolvable:$true] %s65_s22 }
   0xe   :  { %71 = dma.hbm_to_vmem [thread:$0]  %s64_s20, 1024, %s66_s22, [#allocation9], %s564_s9, %s564_s9, %s565_s10  }
   0xf   :  { %555 = dma.done.wait [#allocation3], 256  }
  0x10   :  { %556 = vsyncadd [#allocation3], 4294967040 }
  0x11   :  { %557 = dma.done.wait [#allocation6], 1280  }
  0x12   :  { %558 = vsyncadd [#allocation6], 4294966016 }
  0x13   :  { %559 = dma.done.wait [#allocation9], 1024  }
  0x14   :  { %560 = vsyncadd [#allocation9], 4294966272  ;;  %v401_v0 = vld [vmem:[#allocation5 + $0x8] sm:$0xff]  ;;  %v400_v1 = vld [vmem:[#allocation5] sm:$0xff]  ;;  %vm114_vm0 = vcmask 261120   ;;  %s571_s26 = smov [#allocation10]  }
  0x15   :  { %v409_v2 = vld [vmem:[#allocation7 + $0x38] sm:$0xff]  ;;  %124 = vmatpush.bf16.msra.mxu0 %v401_v0  ;;  %v91_v3 = vld [vmem:[#allocation2] sm:$0xff]  ;;  %v92_v4 = vld [vmem:[#allocation2 + $0x8] sm:$0xff]  ;;  %s310_s27 = sshll.u32 %s571_s26, 4  ;;  %s312_s30 = sshll.u32 %s655_s7, 4  ;;  %s311_s27 = int_to_ptr.vmem [resolvable:$true] %s310_s27  ;;  %s313_s30 = int_to_ptr.hbm [resolvable:$true] %s312_s30 }
  0x16   :  { %203 = vmatpush.bf16.msra.mxu1 %v409_v2  ;;  %v408_v5 = vld [vmem:[#allocation7 + $0x30] sm:$0xff]  ;;  %v93_v6 = vpack.c.bf16 %v92_v4, %v91_v3  ;;  %v407_v7 = vld [vmem:[#allocation7 + $0x28] sm:$0xff]  ;;  %v406_v8 = vld [vmem:[#allocation7 + $0x20] sm:$0xff] }
  0x17   :  { %v405_v9 = vld [vmem:[#allocation7 + $0x18] sm:$0xff]  ;;  %v404_v10 = vld [vmem:[#allocation7 + $0x10] sm:$0xff]  ;;  %v403_v11 = vld [vmem:[#allocation7 + $0x8] sm:$0xff] }
  0x18   :  { %v402_v12 = vld [vmem:[#allocation7] sm:$0xff]  ;;  %v417_v13 = vld [vmem:[#allocation8 + $0x38] sm:$0xff]  ;;  %v416_v14 = vld [vmem:[#allocation8 + $0x30] sm:$0xff] }
  0x19   :  { %125 = vmatpush.bf16.msra.mxu0 %v400_v1  ;;  %288 = vmatpush.bf16.msra.mxu2 %v417_v13  ;;  %v415_v15 = vld [vmem:[#allocation8 + $0x28] sm:$0xff]  ;;  %v414_v16 = vld [vmem:[#allocation8 + $0x20] sm:$0xff]  ;;  %v413_v25 = vld [vmem:[#allocation8 + $0x18] sm:$0xff] }
  0x1a   :  { %204 = vmatpush.bf16.msra.mxu1 %v408_v5  ;;  %v432_v18 = vld [vmem:[%s650_s2] ss:$0 sm:$0xff]  ;;  %v412_v26 = vld [vmem:[#allocation8 + $0x10] sm:$0xff]  ;;  %v411_v27 = vld [vmem:[#allocation8 + $0x8] sm:$0xff] }
  0x1b   :  { %v410_v28 = vld [vmem:[#allocation8] sm:$0xff] }
  0x1c   :  { %335 = vmatmul.msk.bf16.vlgmr.msra.gmra.mxu0 %vm114_vm0, %v93_v6  ;;  %v433_v30 = vld [vmem:[%s652_s4] ss:$0 sm:$0xff] }
  0x1d   :  { %289 = vmatpush.bf16.msra.mxu2 %v416_v14  ;;  %v434_v38 = vld [vmem:[%s654_s6] ss:$0 sm:$0xff] }
  0x1e   :  { %205 = vmatpush.bf16.msra.mxu1 %v407_v7 }
  0x21   :  { %290 = vmatpush.bf16.msra.mxu2 %v415_v15 }
  0x22   :  { %206 = vmatpush.bf16.msra.mxu1 %v406_v8 }
  0x25   :  { %291 = vmatpush.bf16.msra.mxu2 %v414_v16 }
  0x26   :  { %207 = vmatpush.bf16.msra.mxu1 %v405_v9 }
  0x29   :  { %292 = vmatpush.bf16.msra.mxu2 %v413_v25 }
  0x2a   :  { %208 = vmatpush.bf16.msra.mxu1 %v404_v10 }
  0x2d   :  { %293 = vmatpush.bf16.msra.mxu2 %v412_v26 }
  0x2e   :  { %209 = vmatpush.bf16.msra.mxu1 %v403_v11 }
  0x31   :  { %294 = vmatpush.bf16.msra.mxu2 %v411_v27 }
  0x32   :  { %210 = vmatpush.bf16.msra.mxu1 %v402_v12 }
  0x35   :  { %295 = vmatpush.bf16.msra.mxu2 %v410_v28 }
  0x99   :  { %v127_v17 = vpop.f32.mrf.mxu0 }
  0x9a   :  { %v128_v19 = vadd.f32 %v432_v18, %v127_v17 }
  0x9c   :  { %v132_v22 = vmax.f32 %v128_v19, 0.0 }
  0xa1   :  { %v129_v20 = vpop.f32.mrf.mxu0 }
  0xa2   :  { %v130_v21 = vadd.f32 %v432_v18, %v129_v20 }
  0xa4   :  { %v133_v23 = vmax.f32 %v130_v21, 0.0 }
  0xa6   :  { %v134_v24 = vpack.c.bf16 %v133_v23, %v132_v22 }
  0xa8   :  { %211 = vmatmul.bf16.vlgmr.msra.gmra.mxu1 %v134_v24 }
 0x125   :  { %v212_v29 = vpop.f32.mrf.mxu1 }
 0x126   :  { %v213_v31 = vadd.f32 %v433_v30, %v212_v29 }
 0x128   :  { %v217_v34 = vmax.f32 %v213_v31, 0.0 }
 0x12d   :  { %v214_v32 = vpop.f32.mrf.mxu1 }
 0x12e   :  { %v215_v33 = vadd.f32 %v433_v30, %v214_v32 }
 0x130   :  { %v218_v35 = vmax.f32 %v215_v33, 0.0 }
 0x132   :  { %v219_v36 = vpack.c.bf16 %v218_v35, %v217_v34 }
 0x134   :  { %296 = vmatmul.bf16.vlgmr.msra.gmra.mxu2 %v219_v36 }
 0x1b7   :  { %v297_v37 = vpop.f32.mrf.mxu2 }
 0x1b8   :  { %v298_v40 = vadd.f32 %v434_v38, %v297_v37 }
 0x1bf   :  { %v299_v39 = vpop.f32.mrf.mxu2 }
 0x1c0   :  { %v300_v41 = vadd.f32 %v434_v38, %v299_v39 }
 0x1c2   :  { %v421_v42 = vpack.c.bf16 %v300_v41, %v298_v40 }
 0x1c4   :  { %422 = vst [vmem:[#allocation10] sm:$0xff] %v421_v42  }
 0x1c5   :  { %318 = dma.vmem_to_hbm [thread:$0]  %s311_s27, 128, %s313_s30, [#allocation4], %s564_s9, %s564_s9, %s565_s10  }
 0x1c6   :  { %561 = dma.done.wait [#allocation4], 128  }
 0x1c7   :  { %562 = vsyncadd [#allocation4], 4294967168 }
 0x1c8   :  { %323 = vsyncpa [#allocation3], 1 }
 0x1c9   :  { %324 = vsyncpa [#allocation6], 1 }
 0x1ca   :  { %325 = vsyncpa [#allocation9], 1 }
 0x1cb   :  { %326 = vsyncpa [#allocation4], 1 }

// kernel: tpu_custom_call.1
= control target key start
LH: loop header
LB: loop body
LE: loop exit
PB: predicated region body
PF: predicated region fallthrough
CT: control target
= control target key end

     0   :  { %12 = vsyncpa [#allocation3], 0  ;;  %s648_s0 = inlined_call_operand.hbm [shape: f32[16,32], index: 0, kind: input, shape index: {}]   ;;  %s649_s1 = inlined_call_operand.hbm [shape: bf16[32,128], index: 1, kind: input, shape index: {}]   ;;  %s650_s2 = inlined_call_operand.vmem [shape: f32[1,128], index: 2, kind: input, shape index: {}]   ;;  %s651_s3 = inlined_call_operand.hbm [shape: bf16[128,128], index: 3, kind: input, shape index: {}]   ;;  %s652_s4 = inlined_call_operand.vmem [shape: f32[1,128], index: 4, kind: input, shape index: {}]   ;;  %s653_s5 = inlined_call_operand.hbm [shape: bf16[128,128], index: 5, kind: input, shape index: {}]   ;;  %s654_s6 = inlined_call_operand.vmem [shape: f32[1,128], index: 6, kind: input, shape index: {}]   ;;  %s655_s7 = inlined_call_operand.hbm [shape: bf16[16,128], index: 7, kind: output, shape index: {}]  }
   0x1   :  { %13 = vsyncpa [#allocation6], 0 }
   0x2   :  { %14 = vsyncpa [#allocation9], 0  ;;  %s33_s26 = sshll.u32 %s649_s1, 4  ;;  %s34_s26 = int_to_ptr.hbm [resolvable:$true] %s33_s26 }
   0x3   :  { %15 = vsyncpa [#allocation4], 0  ;;  %s563_s27 = smov [#allocation5]   ;;  %s20_s8 = sshll.u32 %s648_s0, 4  ;;  %s21_s8 = int_to_ptr.hbm [resolvable:$true] %s20_s8 }
   0x4   :  { %s35_s28 = sshll.u32 %s563_s27, 4  ;;  %s564_s9 = smov 64   ;;  %s36_s28 = int_to_ptr.vmem [resolvable:$true] %s35_s28 }
   0x5   :  { %s565_s10 = smov 4   ;;  %s566_s11 = smov [#allocation2]  }
   0x6   :  { %41 = dma.hbm_to_vmem [thread:$0]  %s34_s26, 256, %s36_s28, [#allocation6], %s564_s9, %s564_s9, %s565_s10  }
   0x7   :  { %s22_s12 = sshll.u32 %s566_s11, 4  ;;  %s567_s1 = smov 128   ;;  %s23_s12 = int_to_ptr.vmem [resolvable:$true] %s22_s12 }
   0x8   :  { %s568_s13 = smov 8   ;;  %s48_s16 = sshll.u32 %s651_s3, 4  ;;  %s49_s16 = int_to_ptr.hbm [resolvable:$true] %s48_s16 }
   0x9   :  { %28 = dma.hbm_to_vmem [thread:$0]  %s21_s8, 256, %s23_s12, [#allocation3], %s567_s1, %s567_s1, %s568_s13  }
   0xa   :  { %s569_s17 = smov [#allocation7]   ;;  %s63_s20 = sshll.u32 %s653_s5, 4  ;;  %s64_s20 = int_to_ptr.hbm [resolvable:$true] %s63_s20 }
   0xb   :  { %s50_s0 = sshll.u32 %s569_s17, 4  ;;  %s570_s21 = smov [#allocation8]   ;;  %s51_s0 = int_to_ptr.vmem [resolvable:$true] %s50_s0 }
   0xc   :  { %56 = dma.hbm_to_vmem [thread:$0]  %s49_s16, 1024, %s51_s0, [#allocation6], %s564_s9, %s564_s9, %s565_s10  }
   0xd   :  { %s65_s22 = sshll.u32 %s570_s21, 4  ;;  %s66_s22 = int_to_ptr.vmem [resolvable:$true] %s65_s22 }
   0xe   :  { %71 = dma.hbm_to_vmem [thread:$0]  %s64_s20, 1024, %s66_s22, [#allocation9], %s564_s9, %s564_s9, %s565_s10  }
   0xf   :  { %555 = dma.done.wait [#allocation3], 256  }
  0x10   :  { %556 = vsyncadd [#allocation3], 4294967040 }
  0x11   :  { %557 = dma.done.wait [#allocation6], 1280  }
  0x12   :  { %558 = vsyncadd [#allocation6], 4294966016 }
  0x13   :  { %559 = dma.done.wait [#allocation9], 1024  }
  0x14   :  { %560 = vsyncadd [#allocation9], 4294966272  ;;  %v401_v0 = vld [vmem:[#allocation5 + $0x8] sm:$0xff]  ;;  %v400_v1 = vld [vmem:[#allocation5] sm:$0xff]  ;;  %vm114_vm0 = vcmask 261120   ;;  %s571_s26 = smov [#allocation10]  }
  0x15   :  { %v409_v2 = vld [vmem:[#allocation7 + $0x38] sm:$0xff]  ;;  %124 = vmatpush.bf16.msra.mxu0 %v401_v0  ;;  %v91_v3 = vld [vmem:[#allocation2] sm:$0xff]  ;;  %v92_v4 = vld [vmem:[#allocation2 + $0x8] sm:$0xff]  ;;  %s310_s27 = sshll.u32 %s571_s26, 4  ;;  %s312_s30 = sshll.u32 %s655_s7, 4  ;;  %s311_s27 = int_to_ptr.vmem [resolvable:$true] %s310_s27  ;;  %s313_s30 = int_to_ptr.hbm [resolvable:$true] %s312_s30 }
  0x16   :  { %203 = vmatpush.bf16.msra.mxu1 %v409_v2  ;;  %v408_v5 = vld [vmem:[#allocation7 + $0x30] sm:$0xff]  ;;  %v93_v6 = vpack.c.bf16 %v92_v4, %v91_v3  ;;  %v407_v7 = vld [vmem:[#allocation7 + $0x28] sm:$0xff]  ;;  %v406_v8 = vld [vmem:[#allocation7 + $0x20] sm:$0xff] }
  0x17   :  { %v405_v9 = vld [vmem:[#allocation7 + $0x18] sm:$0xff]  ;;  %v404_v10 = vld [vmem:[#allocation7 + $0x10] sm:$0xff]  ;;  %v403_v11 = vld [vmem:[#allocation7 + $0x8] sm:$0xff] }
  0x18   :  { %v402_v12 = vld [vmem:[#allocation7] sm:$0xff]  ;;  %v417_v13 = vld [vmem:[#allocation8 + $0x38] sm:$0xff]  ;;  %v416_v14 = vld [vmem:[#allocation8 + $0x30] sm:$0xff] }
  0x19   :  { %125 = vmatpush.bf16.msra.mxu0 %v400_v1  ;;  %288 = vmatpush.bf16.msra.mxu2 %v417_v13  ;;  %v415_v15 = vld [vmem:[#allocation8 + $0x28] sm:$0xff]  ;;  %v414_v16 = vld [vmem:[#allocation8 + $0x20] sm:$0xff]  ;;  %v413_v25 = vld [vmem:[#allocation8 + $0x18] sm:$0xff] }
  0x1a   :  { %204 = vmatpush.bf16.msra.mxu1 %v408_v5  ;;  %v432_v18 = vld [vmem:[%s650_s2] ss:$0 sm:$0xff]  ;;  %v412_v26 = vld [vmem:[#allocation8 + $0x10] sm:$0xff]  ;;  %v411_v27 = vld [vmem:[#allocation8 + $0x8] sm:$0xff] }
  0x1b   :  { %v410_v28 = vld [vmem:[#allocation8] sm:$0xff] }
  0x1c   :  { %335 = vmatmul.msk.bf16.vlgmr.msra.gmra.mxu0 %vm114_vm0, %v93_v6  ;;  %v433_v30 = vld [vmem:[%s652_s4] ss:$0 sm:$0xff] }
  0x1d   :  { %289 = vmatpush.bf16.msra.mxu2 %v416_v14  ;;  %v434_v38 = vld [vmem:[%s654_s6] ss:$0 sm:$0xff] }
  0x1e   :  { %205 = vmatpush.bf16.msra.mxu1 %v407_v7 }
  0x21   :  { %290 = vmatpush.bf16.msra.mxu2 %v415_v15 }
  0x22   :  { %206 = vmatpush.bf16.msra.mxu1 %v406_v8 }
  0x25   :  { %291 = vmatpush.bf16.msra.mxu2 %v414_v16 }
  0x26   :  { %207 = vmatpush.bf16.msra.mxu1 %v405_v9 }
  0x29   :  { %292 = vmatpush.bf16.msra.mxu2 %v413_v25 }
  0x2a   :  { %208 = vmatpush.bf16.msra.mxu1 %v404_v10 }
  0x2d   :  { %293 = vmatpush.bf16.msra.mxu2 %v412_v26 }
  0x2e   :  { %209 = vmatpush.bf16.msra.mxu1 %v403_v11 }
  0x31   :  { %294 = vmatpush.bf16.msra.mxu2 %v411_v27 }
  0x32   :  { %210 = vmatpush.bf16.msra.mxu1 %v402_v12 }
  0x35   :  { %295 = vmatpush.bf16.msra.mxu2 %v410_v28 }
  0x99   :  { %v127_v17 = vpop.f32.mrf.mxu0 }
  0x9a   :  { %v128_v19 = vadd.f32 %v432_v18, %v127_v17 }
  0x9c   :  { %v132_v22 = vmax.f32 %v128_v19, 0.0 }
  0xa1   :  { %v129_v20 = vpop.f32.mrf.mxu0 }
  0xa2   :  { %v130_v21 = vadd.f32 %v432_v18, %v129_v20 }
  0xa4   :  { %v133_v23 = vmax.f32 %v130_v21, 0.0 }
  0xa6   :  { %v134_v24 = vpack.c.bf16 %v133_v23, %v132_v22 }
  0xa8   :  { %211 = vmatmul.bf16.vlgmr.msra.gmra.mxu1 %v134_v24 }
 0x125   :  { %v212_v29 = vpop.f32.mrf.mxu1 }
 0x126   :  { %v213_v31 = vadd.f32 %v433_v30, %v212_v29 }
 0x128   :  { %v217_v34 = vmax.f32 %v213_v31, 0.0 }
 0x12d   :  { %v214_v32 = vpop.f32.mrf.mxu1 }
 0x12e   :  { %v215_v33 = vadd.f32 %v433_v30, %v214_v32 }
 0x130   :  { %v218_v35 = vmax.f32 %v215_v33, 0.0 }
 0x132   :  { %v219_v36 = vpack.c.bf16 %v218_v35, %v217_v34 }
 0x134   :  { %296 = vmatmul.bf16.vlgmr.msra.gmra.mxu2 %v219_v36 }
 0x1b7   :  { %v297_v37 = vpop.f32.mrf.mxu2 }
 0x1b8   :  { %v298_v40 = vadd.f32 %v434_v38, %v297_v37 }
 0x1bf   :  { %v299_v39 = vpop.f32.mrf.mxu2 }
 0x1c0   :  { %v300_v41 = vadd.f32 %v434_v38, %v299_v39 }
 0x1c2   :  { %v421_v42 = vpack.c.bf16 %v300_v41, %v298_v40 }
 0x1c4   :  { %422 = vst [vmem:[#allocation10] sm:$0xff] %v421_v42  }
 0x1c5   :  { %318 = dma.vmem_to_hbm [thread:$0]  %s311_s27, 128, %s313_s30, [#allocation4], %s564_s9, %s564_s9, %s565_s10  }
 0x1c6   :  { %561 = dma.done.wait [#allocation4], 128  }
 0x1c7   :  { %562 = vsyncadd [#allocation4], 4294967168 }
 0x1c8   :  { %323 = vsyncpa [#allocation3], 1 }
 0x1c9   :  { %324 = vsyncpa [#allocation6], 1 }
 0x1ca   :  { %325 = vsyncpa [#allocation9], 1 }
 0x1cb   :  { %326 = vsyncpa [#allocation4], 1 }

</bundles_post_ra>
